<compile_context>
chip_gen: v7x
topology: tpu7x:2x2x1
jax: 0.10.0
libtpu: 0.0.40
codegen_flags: <defaults>
</compile_context>

<pallas_src>
import functools

import jax
import jax.numpy as jnp
from jax.experimental import pallas as pl
from jax.experimental.pallas import tpu as pltpu


def _round_up(x, m):
    return (x + m - 1) // m * m


def _flash_attn_kernel(q_ref, k_ref, v_ref, mask_ref, o_ref,
                       m_scr, l_scr, acc_scr,
                       *, num_kv, mask_kv, compute_dtype):
    """Online-softmax attention for one (batch, head, q-tile); grid axis 3 = KV tiles."""
    kv = pl.program_id(3)

    @pl.when(kv == 0)
    def _init():
        m_scr[...] = jnp.full_like(m_scr, -jnp.inf)
        l_scr[...] = jnp.zeros_like(l_scr)
        acc_scr[...] = jnp.zeros_like(acc_scr)

    # scores: (Tq, D) x (Tkv, D)^T -> (Tq, Tkv), contracted on the head dim, f32 acc.
    s = jax.lax.dot_general(q_ref[...], k_ref[...], (((1,), (1,)), ((), ())),
                            preferred_element_type=jnp.float32)
    if mask_kv:
        s = s + mask_ref[...]        # (1, Tkv) additive pad mask (0 / -1e30), one VPU add

    # online softmax update (f32 statistics).
    m_prev = m_scr[...]
    m_new = jnp.maximum(m_prev, jnp.max(s, axis=-1, keepdims=True))
    alpha = jnp.exp(m_prev - m_new)
    p = jnp.exp(s - m_new)
    l_scr[...] = alpha * l_scr[...] + jnp.sum(p, axis=-1, keepdims=True)
    acc_scr[...] = alpha * acc_scr[...] + jnp.dot(
        p.astype(compute_dtype), v_ref[...], preferred_element_type=jnp.float32)
    m_scr[...] = m_new

    @pl.when(kv == num_kv - 1)
    def _finalize():
        # exact divide: l is only (Tq, 1), the approximate EUP path buys nothing here.
        o_ref[...] = (acc_scr[...] / l_scr[...]).astype(o_ref.dtype)


@functools.partial(jax.jit, static_argnames=("n_heads",))
def multi_head_attention(query, key, value, params, n_heads):
    """query/key/value: (B, N, E).  params: PyTorch-layout weights (out, in) + biases."""
    B, N, E = query.shape
    H = n_heads
    D = E // n_heads
    compute_dtype = jnp.bfloat16
    out_dtype = query.dtype
    inv_scale = 1.0 / float(D) ** 0.5

    # Sequence tiling: 256-row tiles when possible; small N rounds to the bf16 tile (16).
    Tq = 256 if N >= 256 else _round_up(N, 16)
    Tkv = Tq
    Np = _round_up(N, Tq)
    num_q = Np // Tq
    num_kv = Np // Tkv
    mask_kv = Np != N

    # ---- projections hoisted out of the flash loop (one pass, bf16 in / f32 acc) ----
    def project(x, w, b):
        y = jnp.einsum('bne,fe->bnf', x.astype(compute_dtype), w.astype(compute_dtype),
                       preferred_element_type=jnp.float32)
        return y + b.astype(jnp.float32)

    # fold 1/sqrt(D) into the query projection (scales the (E,E) weight once).
    q = project(query, params["wq"] * inv_scale, params["bq"] * inv_scale)
    k = project(key, params["wk"], params["bk"])
    v = project(value, params["wv"], params["bv"])

    def to_heads(t):                      # (B, N, E) -> (B, H, Np, D), bf16, seq-padded
        t = t.reshape(B, N, H, D).transpose(0, 2, 1, 3).astype(compute_dtype)
        if mask_kv:
            t = jnp.pad(t, ((0, 0), (0, 0), (0, Np - N), (0, 0)))
        return t

    qh, kh, vh = to_heads(q), to_heads(k), to_heads(v)

    # additive padding mask over key positions: 0 for valid columns, -1e30 for padding.
    col = jnp.arange(Np, dtype=jnp.int32)[None, :]
    mask = jnp.where(col < N, 0.0, -1e30).astype(jnp.float32)

    kernel = functools.partial(_flash_attn_kernel, num_kv=num_kv,
                               mask_kv=mask_kv, compute_dtype=compute_dtype)

    q_spec = pl.BlockSpec((None, None, Tq, D), lambda b, h, qi, kv: (b, h, qi, 0))
    kv_spec = pl.BlockSpec((None, None, Tkv, D), lambda b, h, qi, kv: (b, h, kv, 0))
    mask_spec = pl.BlockSpec((1, Tkv), lambda b, h, qi, kv: (0, kv))
    out_spec = pl.BlockSpec((None, None, Tq, D), lambda b, h, qi, kv: (b, h, qi, 0))

    o_heads = pl.pallas_call(
        kernel,
        out_shape=jax.ShapeDtypeStruct((B, H, Np, D), compute_dtype),
        grid_spec=pltpu.PrefetchScalarGridSpec(
            num_scalar_prefetch=0,
            grid=(B, H, num_q, num_kv),
            in_specs=[q_spec, kv_spec, kv_spec, mask_spec],
            out_specs=out_spec,
            scratch_shapes=[
                pltpu.VMEM((Tq, 1), jnp.float32),   # running max m
                pltpu.VMEM((Tq, 1), jnp.float32),   # running denom l
                pltpu.VMEM((Tq, D), jnp.float32),   # attention accumulator
            ]),
        compiler_params=pltpu.CompilerParams(
            # B, H, q-tiles are independent (shard across v7x's 2 TCs); KV is the reduction.
            dimension_semantics=("parallel", "parallel", "parallel", "arbitrary"),
            vmem_limit_bytes=32 * 1024 * 1024),
    )(qh, kh, vh, mask)

    # ---- merge heads and run the output projection as one full-depth (K=H*D) GEMM ----
    o = o_heads.transpose(0, 2, 1, 3).reshape(B, Np, E)
    if mask_kv:
        o = o[:, :N, :]
    out = jnp.einsum('bne,fe->bnf', o, params["wp"].astype(compute_dtype),
                     preferred_element_type=jnp.float32) + params["bp"].astype(jnp.float32)
    return out.astype(out_dtype)


def _reference(query, key, value, params, n_heads):
    """Pure-JAX f32 reference mirroring the PyTorch forward (eval mode)."""
    B, N, E = query.shape
    D = E // n_heads
    scale = jnp.sqrt(jnp.float32(D))

    def lin(x, w, b):
        return x @ w.T + b

    q = lin(query, params["wq"], params["bq"])
    k = lin(key, params["wk"], params["bk"])
    v = lin(value, params["wv"], params["bv"])

    def to_heads(t):
        return t.reshape(B, N, n_heads, D).transpose(0, 2, 1, 3)

    q, k, v = map(to_heads, (q, k, v))
    logits = jnp.einsum('bhid,bhjd->bhij', q, k) / scale
    attn = jax.nn.softmax(logits, axis=-1)
    o = jnp.einsum('bhij,bhjd->bhid', attn, v)
    o = o.transpose(0, 2, 1, 3).reshape(B, N, E)
    return lin(o, params["wp"], params["bp"])


if __name__ == "__main__":
    B, N, E, H = 2, 8, 32, 4

    key0 = jax.random.PRNGKey(0)
    keys = jax.random.split(key0, 12)
    init = lambda k, shape: (jax.random.normal(k, shape, jnp.float32) * 0.05)

    params = {
        "wq": init(keys[0], (E, E)), "bq": init(keys[1], (E,)),
        "wk": init(keys[2], (E, E)), "bk": init(keys[3], (E,)),
        "wv": init(keys[4], (E, E)), "bv": init(keys[5], (E,)),
        "wp": init(keys[6], (E, E)), "bp": init(keys[7], (E,)),
    }

    query = jax.random.normal(keys[8], (B, N, E), jnp.float32)
    key_in = jax.random.normal(keys[9], (B, N, E), jnp.float32)
    value = jax.random.normal(keys[10], (B, N, E), jnp.float32)

    out = multi_head_attention(query, key_in, value, params, H)
    out = jax.block_until_ready(out)

    ref = _reference(query, key_in, value, params, H)
    assert out.shape == (B, N, E)
    # bf16 matmuls with f32 accumulation: allow bf16-level tolerance vs the f32 reference.
    assert jnp.allclose(out, ref, atol=2e-2, rtol=2e-2), (
        f"max abs diff {jnp.max(jnp.abs(out - ref))}")

    print("KERNEL_OK")
</pallas_src>

<mosaic_0001>
module attributes {stable_mosaic.version = 11 : i64} {
  func.func @_flash_attn_kernel(%arg0: i32, %arg1: i32, %arg2: i32, %arg3: i32, %arg4: memref<1x1x16x8xbf16, #tpu.memory_space<vmem>>, %arg5: memref<1x1x16x8xbf16, #tpu.memory_space<vmem>>, %arg6: memref<1x1x16x8xbf16, #tpu.memory_space<vmem>>, %arg7: memref<1x16xf32, #tpu.memory_space<vmem>>, %arg8: memref<1x1x16x8xbf16, #tpu.memory_space<vmem>>, %arg9: memref<16x1xf32, #tpu.memory_space<vmem>>, %arg10: memref<16x1xf32, #tpu.memory_space<vmem>>, %arg11: memref<16x8xf32, #tpu.memory_space<vmem>>) attributes {dimension_semantics = [#tpu.dimension_semantics<parallel>, #tpu.dimension_semantics<parallel>, #tpu.dimension_semantics<parallel>, #tpu.dimension_semantics<arbitrary>], iteration_bounds = array<i64: 2, 4, 1, 1>, scalar_prefetch = 0 : i64, scratch_operands = 3 : i64, tpu.core_type = #tpu.core_type<tc>, window_params = [{transform_indices = @transform_0, window_bounds = array<i64: 1, 1, 16, 8>}, {transform_indices = @transform_1, window_bounds = array<i64: 1, 1, 16, 8>}, {transform_indices = @transform_2, window_bounds = array<i64: 1, 1, 16, 8>}, {transform_indices = @transform_3, window_bounds = array<i64: 1, 16>}, {transform_indices = @transform_4, window_bounds = array<i64: 1, 1, 16, 8>}]} {
    %c0_i32 = arith.constant 0 : i32
    %0 = arith.cmpi eq, %arg3, %c0_i32 : i32
    %1 = arith.extui %0 : i1 to i32
    %c0_i32_0 = arith.constant 0 : i32
    %2 = arith.cmpi ne, %1, %c0_i32_0 : i32
    scf.if %2 {
      %cst_31 = arith.constant 0xFF800000 : f32
      %39 = vector.broadcast %cst_31 : f32 to vector<16x1xf32>
      %c0_32 = arith.constant 0 : index
      %c0_33 = arith.constant 0 : index
      %40 = vector.load %arg9[%c0_32, %c0_33] : memref<16x1xf32, #tpu.memory_space<vmem>>, vector<16x1xf32>
      tpu.vector_store %arg9[%c0_32, %c0_33], %39 {strides = array<i32>} : memref<16x1xf32, #tpu.memory_space<vmem>>, vector<16x1xf32>,
      %cst_34 = arith.constant 0.000000e+00 : f32
      %41 = vector.broadcast %cst_34 : f32 to vector<16x1xf32>
      %c0_35 = arith.constant 0 : index
      %c0_36 = arith.constant 0 : index
      %42 = vector.load %arg10[%c0_35, %c0_36] : memref<16x1xf32, #tpu.memory_space<vmem>>, vector<16x1xf32>
      tpu.vector_store %arg10[%c0_35, %c0_36], %41 {strides = array<i32>} : memref<16x1xf32, #tpu.memory_space<vmem>>, vector<16x1xf32>,
      %cst_37 = arith.constant 0.000000e+00 : f32
      %43 = vector.broadcast %cst_37 : f32 to vector<16x8xf32>
      %c0_38 = arith.constant 0 : index
      %c0_39 = arith.constant 0 : index
      %44 = vector.load %arg11[%c0_38, %c0_39] : memref<16x8xf32, #tpu.memory_space<vmem>>, vector<16x8xf32>
      tpu.vector_store %arg11[%c0_38, %c0_39], %43 {strides = array<i32>} : memref<16x8xf32, #tpu.memory_space<vmem>>, vector<16x8xf32>,
    } else {
    }
    %c0 = arith.constant 0 : index
    %c0_1 = arith.constant 0 : index
    %c0_2 = arith.constant 0 : index
    %c0_3 = arith.constant 0 : index
    %3 = vector.load %arg4[%c0, %c0_1, %c0_2, %c0_3] : memref<1x1x16x8xbf16, #tpu.memory_space<vmem>>, vector<1x1x16x8xbf16>
    %4 = vector.shape_cast %3 : vector<1x1x16x8xbf16> to vector<16x8xbf16>
    %c0_4 = arith.constant 0 : index
    %c0_5 = arith.constant 0 : index
    %c0_6 = arith.constant 0 : index
    %c0_7 = arith.constant 0 : index
    %5 = vector.load %arg5[%c0_4, %c0_5, %c0_6, %c0_7] : memref<1x1x16x8xbf16, #tpu.memory_space<vmem>>, vector<1x1x16x8xbf16>
    %6 = vector.shape_cast %5 : vector<1x1x16x8xbf16> to vector<16x8xbf16>
    %cst = arith.constant dense<0.000000e+00> : vector<16x16xf32>
    %7 = tpu.matmul %4, %6, %cst {dimension_numbers = #tpu.dot_dimension_numbers<[1], [1], [0], [0], [0, 0, 1, 0], [], []>} : vector<16x8xbf16>, vector<16x8xbf16>, vector<16x16xf32> -> vector<16x16xf32>
    %c0_8 = arith.constant 0 : index
    %c0_9 = arith.constant 0 : index
    %8 = vector.load %arg7[%c0_8, %c0_9] : memref<1x16xf32, #tpu.memory_space<vmem>>, vector<1x16xf32>
    %9 = vector.broadcast %8 : vector<1x16xf32> to vector<16x16xf32>
    %10 = arith.addf %7, %9 : vector<16x16xf32>
    %c0_10 = arith.constant 0 : index
    %c0_11 = arith.constant 0 : index
    %11 = vector.load %arg9[%c0_10, %c0_11] : memref<16x1xf32, #tpu.memory_space<vmem>>, vector<16x1xf32>
    %cst_12 = arith.constant dense<0xFF800000> : vector<16xf32>
    %12 = vector.multi_reduction <maximumf>, %10, %cst_12 [1] : vector<16x16xf32> to vector<16xf32>
    %13 = vector.shape_cast %12 : vector<16xf32> to vector<16x1xf32>
    %14 = arith.maximumf %11, %13 : vector<16x1xf32>
    %15 = arith.subf %11, %14 : vector<16x1xf32>
    %16 = math.exp %15 : vector<16x1xf32>
    %17 = vector.broadcast %14 : vector<16x1xf32> to vector<16x16xf32>
    %18 = arith.subf %10, %17 : vector<16x16xf32>
    %19 = math.exp %18 : vector<16x16xf32>
    %c0_13 = arith.constant 0 : index
    %c0_14 = arith.constant 0 : index
    %20 = vector.load %arg10[%c0_13, %c0_14] : memref<16x1xf32, #tpu.memory_space<vmem>>, vector<16x1xf32>
    %21 = arith.mulf %16, %20 : vector<16x1xf32>
    %cst_15 = arith.constant dense<0.000000e+00> : vector<16xf32>
    %22 = vector.multi_reduction <add>, %19, %cst_15 [1] : vector<16x16xf32> to vector<16xf32>
    %23 = vector.shape_cast %22 : vector<16xf32> to vector<16x1xf32>
    %24 = arith.addf %21, %23 : vector<16x1xf32>
    %c0_16 = arith.constant 0 : index
    %c0_17 = arith.constant 0 : index
    %25 = vector.load %arg10[%c0_16, %c0_17] : memref<16x1xf32, #tpu.memory_space<vmem>>, vector<16x1xf32>
    tpu.vector_store %arg10[%c0_16, %c0_17], %24 {strides = array<i32>} : memref<16x1xf32, #tpu.memory_space<vmem>>, vector<16x1xf32>,
    %c0_18 = arith.constant 0 : index
    %c0_19 = arith.constant 0 : index
    %26 = vector.load %arg11[%c0_18, %c0_19] : memref<16x8xf32, #tpu.memory_space<vmem>>, vector<16x8xf32>
    %27 = vector.broadcast %16 : vector<16x1xf32> to vector<16x8xf32>
    %28 = arith.mulf %27, %26 : vector<16x8xf32>
    %29 = arith.truncf %19 : vector<16x16xf32> to vector<16x16xbf16>
    %c0_20 = arith.constant 0 : index
    %c0_21 = arith.constant 0 : index
    %c0_22 = arith.constant 0 : index
    %c0_23 = arith.constant 0 : index
    %30 = vector.load %arg6[%c0_20, %c0_21, %c0_22, %c0_23] : memref<1x1x16x8xbf16, #tpu.memory_space<vmem>>, vector<1x1x16x8xbf16>
    %31 = vector.shape_cast %30 : vector<1x1x16x8xbf16> to vector<16x8xbf16>
    %cst_24 = arith.constant dense<0.000000e+00> : vector<16x8xf32>
    %32 = tpu.matmul %29, %31, %cst_24 {dimension_numbers = #tpu.dot_dimension_numbers<[1], [0], [0], [1], [0, 0, 1, 1], [], []>} : vector<16x16xbf16>, vector<16x8xbf16>, vector<16x8xf32> -> vector<16x8xf32>
    %33 = arith.addf %28, %32 : vector<16x8xf32>
    %c0_25 = arith.constant 0 : index
    %c0_26 = arith.constant 0 : index
    %34 = vector.load %arg11[%c0_25, %c0_26] : memref<16x8xf32, #tpu.memory_space<vmem>>, vector<16x8xf32>
    tpu.vector_store %arg11[%c0_25, %c0_26], %33 {strides = array<i32>} : memref<16x8xf32, #tpu.memory_space<vmem>>, vector<16x8xf32>,
    %c0_27 = arith.constant 0 : index
    %c0_28 = arith.constant 0 : index
    %35 = vector.load %arg9[%c0_27, %c0_28] : memref<16x1xf32, #tpu.memory_space<vmem>>, vector<16x1xf32>
    tpu.vector_store %arg9[%c0_27, %c0_28], %14 {strides = array<i32>} : memref<16x1xf32, #tpu.memory_space<vmem>>, vector<16x1xf32>,
    %c0_i32_29 = arith.constant 0 : i32
    %36 = arith.cmpi eq, %arg3, %c0_i32_29 : i32
    %37 = arith.extui %36 : i1 to i32
    %c0_i32_30 = arith.constant 0 : i32
    %38 = arith.cmpi ne, %37, %c0_i32_30 : i32
    scf.if %38 {
      %c0_31 = arith.constant 0 : index
      %c0_32 = arith.constant 0 : index
      %39 = vector.load %arg11[%c0_31, %c0_32] : memref<16x8xf32, #tpu.memory_space<vmem>>, vector<16x8xf32>
      %c0_33 = arith.constant 0 : index
      %c0_34 = arith.constant 0 : index
      %40 = vector.load %arg10[%c0_33, %c0_34] : memref<16x1xf32, #tpu.memory_space<vmem>>, vector<16x1xf32>
      %41 = vector.broadcast %40 : vector<16x1xf32> to vector<16x8xf32>
      %42 = arith.divf %39, %41 : vector<16x8xf32>
      %43 = arith.truncf %42 : vector<16x8xf32> to vector<16x8xbf16>
      %c0_35 = arith.constant 0 : index
      %c0_36 = arith.constant 0 : index
      %c0_37 = arith.constant 0 : index
      %c0_38 = arith.constant 0 : index
      %44 = vector.load %arg8[%c0_35, %c0_36, %c0_37, %c0_38] : memref<1x1x16x8xbf16, #tpu.memory_space<vmem>>, vector<1x1x16x8xbf16>
      %45 = vector.shape_cast %44 : vector<1x1x16x8xbf16> to vector<16x8xbf16>
      %46 = vector.shape_cast %43 : vector<16x8xbf16> to vector<1x1x16x8xbf16>
      tpu.vector_store %arg8[%c0_35, %c0_36, %c0_37, %c0_38], %46 {strides = array<i32>} : memref<1x1x16x8xbf16, #tpu.memory_space<vmem>>, vector<1x1x16x8xbf16>,
    } else {
    }
    return
  }
  func.func @transform_0(%arg0: i32, %arg1: i32, %arg2: i32, %arg3: i32) -> (i32, i32, i32, i32) {
    %c0_i32 = arith.constant 0 : i32
    %c0_i32_0 = arith.constant 0 : i32
    return %arg0, %arg1, %arg2, %c0_i32 : i32, i32, i32, i32
  }
  func.func @transform_1(%arg0: i32, %arg1: i32, %arg2: i32, %arg3: i32) -> (i32, i32, i32, i32) {
    %c0_i32 = arith.constant 0 : i32
    %c0_i32_0 = arith.constant 0 : i32
    return %arg0, %arg1, %arg3, %c0_i32 : i32, i32, i32, i32
  }
  func.func @transform_2(%arg0: i32, %arg1: i32, %arg2: i32, %arg3: i32) -> (i32, i32, i32, i32) {
    %c0_i32 = arith.constant 0 : i32
    %c0_i32_0 = arith.constant 0 : i32
    return %arg0, %arg1, %arg3, %c0_i32 : i32, i32, i32, i32
  }
  func.func @transform_3(%arg0: i32, %arg1: i32, %arg2: i32, %arg3: i32) -> (i32, i32) {
    %c0_i32 = arith.constant 0 : i32
    %c0_i32_0 = arith.constant 0 : i32
    return %c0_i32, %arg3 : i32, i32
  }
  func.func @transform_4(%arg0: i32, %arg1: i32, %arg2: i32, %arg3: i32) -> (i32, i32, i32, i32) {
    %c0_i32 = arith.constant 0 : i32
    %c0_i32_0 = arith.constant 0 : i32
    return %arg0, %arg1, %arg2, %c0_i32 : i32, i32, i32, i32
  }
}

</mosaic_0001>

<bundles_post_ra>
// kernel: multi_head_attention.1
= control target key start
LH: loop header
LB: loop body
LE: loop exit
PB: predicated region body
PF: predicated region fallthrough
CT: control target
= control target key end

     0   :  { %s978_s15 = smov 0   ;;  %s980_s16 = smov 0   ;;  %s1063_s0 = inlined_call_operand.vmem [shape: bf16[2,4,16,8], index: 0, kind: input, shape index: {}]   ;;  %s1064_s1 = inlined_call_operand.vmem [shape: bf16[2,4,16,8], index: 1, kind: input, shape index: {}]   ;;  %s1065_s2 = inlined_call_operand.vmem [shape: bf16[2,4,16,8], index: 2, kind: input, shape index: {}]   ;;  %s1066_s3 = inlined_call_operand.vmem [shape: f32[1,16], index: 3, kind: input, shape index: {}]   ;;  %s1067_s4 = inlined_call_operand.vmem [shape: bf16[2,4,16,8], index: 4, kind: output, shape index: {}]  }
   0x1   :  { %s982_s17 = smov 0   ;;  %s984_s18 = smov 0  }
   0x2   :  { %s986_s19 = smov 0  }
   0x3 LB: > { %s36_s20 = sadd.s32 1, %s939_s17  ;;  %s40_s21 = sadd.s32 1, %s943_s18  ;;  %s947_s19 = sphi %s986_s19, %s14_s19   ;;  %s943_s18 = sphi %s984_s18, %s1071_s18   ;;  %s939_s17 = sphi %s982_s17, %s1070_s17   ;;  %s935_s16 = sphi %s980_s16, %s1069_s16   ;;  %s931_s15 = sphi %s978_s15, %s1068_s15  }
   0x4   : > { %p38_p0 = scmp.ge.s32.totalorder %s36_s20, 4  ;;  %p807_p1 = scmp.ge.s32.totalorder %s947_s19, 1 }
   0x5   : > { %p259_p2 = scmp.lt.s32.totalorder %s947_s19, 9 }
   0x6   : > { %s1073_s20 = smov (%p38_p0, %s36_s20), 0  ;;  %s1075_s21 = smov (!%p38_p0, %s40_s21), %s943_s18 }
   0x7   : > { %p260_p3 = pnand %p807_p1, %p259_p2  ;;  %p42_p4 = scmp.ge.s32.totalorder %s1075_s21, 2 }
   0x8   : > { %p331_p5 = scmp.lt.s32.totalorder (!%p260_p3), %s935_s16, 1  ;;  %p333_p6 = scmp.lt.s32.totalorder (!%p260_p3), %s931_s15, 3  ;;  %vm399_vm0 = vcmask (!%p260_p3), 64512   ;;  %v949_v0 = vmov (!%p260_p3), 0.0   ;;  %vm950_vm1 = vmmov (!%p260_p3), 0   ;;  %vm394_vm2 = vcmask (!%p260_p3), 7168  }
   0x9   : > { %s1077_s21 = smov (%p42_p4, %s1075_s21), 0  ;;  %263 = sbr.rel (%p260_p3) target bundleno = 833 (0x341), region = 36 }
   0xa   : > { %836 = vmatprep.subr.bf16.mxu0 (!%p260_p3), %v949_v0  ;;  %400 = vst.msk [vmem:[#allocation4] sm:$0xff] (!%p260_p3), %vm399_vm0, %v949_v0  ;;  %401 = vst.msk [vmem:[#allocation4 + $0x8] sm:$0xff] (!%p260_p3), %vm399_vm0, %v949_v0  ;;  %838 = vmatprep.mubr.msk.bf16.mxu0 (!%p260_p3), %vm950_vm1, %v949_v0  ;;  %v951_v4 = vmov (!%p260_p3), -inf   ;;  %v820_v5 = vld [vmem:[%s1066_s3] ss:$0 sm:$0xff] (!%p260_p3)  ;;  %vm473_vm3 = vcmask (!%p260_p3), 130048  }
   0xb   : > { %842 = vmatprep.subr.bf16.mxu1 (!%p260_p3), %v949_v0  ;;  %844 = vmatprep.mubr.msk.bf16.mxu1 (!%p260_p3), %vm950_vm1, %v949_v0  ;;  %395 = vst.msk [vmem:[#allocation2] sm:$0xff] (!%p260_p3), %vm394_vm2, %v951_v4  ;;  %396 = vst.msk [vmem:[#allocation2 + $0x8] sm:$0xff] (!%p260_p3), %vm394_vm2, %v951_v4  ;;  %v952_v14 = vmov (!%p260_p3), 0   ;;  %vm621_vm4 = vcmask (!%p260_p3), 60416  }
   0xc   : > { %397 = vst.msk [vmem:[#allocation3] sm:$0xff] (!%p260_p3), %vm394_vm2, %v949_v0  ;;  %398 = vst.msk [vmem:[#allocation3 + $0x8] sm:$0xff] (!%p260_p3), %vm394_vm2, %v949_v0  ;;  %892 = vset.pattern.permute.xlu1 (!%p260_p3), %v952_v14  ;;  %893 = vset.pattern.permute.xlu0 (!%p260_p3), %v952_v14 }
  0x10   : > { %s1079_s16 = smov (!%p331_p5, %s935_s16), 1  ;;  %s1081_s15 = smov (!%p333_p6, %s931_s15), 3 }
  0x11   : > { %s809_s22 = sshll.u32 %s1079_s16, 3  ;;  %s808_s23 = sshll.u32 %s1081_s15, 1  ;;  %v519_v49 = vld [vmem:[#allocation4] sm:$0xff]  ;;  %v520_v51 = vld [vmem:[#allocation4 + $0x8] sm:$0xff] }
  0x12   : > { %s340_s24 = sadd.s32 %s809_s22, %s808_s23  ;;  %v471_v15 = vld [vmem:[#allocation2] sm:$0xff]  ;;  %v472_v18 = vld [vmem:[#allocation2 + $0x8] sm:$0xff] }
  0x13   : > { %s1010_s25 = sshll.u32 %s340_s24, 2  ;;  %v504_v39 = vld [vmem:[#allocation3] sm:$0xff]  ;;  %v505_v42 = vld [vmem:[#allocation3 + $0x8] sm:$0xff] }
  0x14   : > { %s356_s28 = scalar_lea.vmem %s1064_s1, %s1010_s25  ;;  %s342_s5 = scalar_lea.vmem %s1063_s0, %s1010_s25 }
  0x15   : > { %v894_v1 = vld [vmem:[%s356_s28] sm:$0xff]   ;;  %s370_s10 = scalar_lea.vmem %s1065_s2, %s1010_s25  ;;  %s387_s13 = scalar_lea.vmem %s1067_s4, %s1010_s25 }
  0x16   : > { %v428_v2 = vsel %vm399_vm0, %v894_v1, 0  ;;  %v895_v3 = vld [vmem:[%s342_s5] sm:$0xff]  }
  0x17   : > { %837 = vmatpush3.bf16.xpose.msra.mxu0 %v428_v2  ;;  %v896_v23 = vld [vmem:[%s370_s10] sm:$0xff]  }
  0x18   : > { %843 = vmatpush3.bf16.msra.mxu1 %v896_v23 }
  0x1e   : > { %839 = vmatmul.mubr.msk.bf16.vlgmr.msra.gmra.mrb[0].mxu0 %vm399_vm0, %v895_v3 }
  0xf1   : > { %v464_v6 = vpop.f32.mrb[0].mxu0 }
  0xf2   : > { %v465_v7 = vadd.f32 %v820_v5, %v464_v6  ;;  %v840_v8 = vpop.f32.mrb[1].mxu0 }
  0xf3   : > { %v467_v9 = vpop.f32.mrb[2].mxu0 }
  0xf4   : > { %v468_v10 = vadd.f32 %v820_v5, %v467_v9  ;;  %v841_v11 = vpop.f32.mrb[3].mxu0  ;;  %v474_v12 = vsel %vm473_vm3, %v465_v7, -inf }
  0xf5   : > { %475 = vmax.xlane.f32.xlu0 %v474_v12 }
  0xf6   : > { %v477_v13 = vsel %vm473_vm3, %v468_v10, -inf }
  0xf9   : > { %478 = vmax.xlane.f32.xlu0 %v477_v13 }
 0x182   : > { %v476_v16 = vpop.xlane.xlu0 %475 }
 0x183   : > { %v480_v17 = vmax.f32 %v471_v15, %v476_v16 }
 0x185   : > { %v482_v19 = vsub.f32 %v471_v15, %v480_v17  ;;  %590 = vst.msk [vmem:[#allocation2] sm:$0xff] %vm394_vm2, %v480_v17  ;;  %490 = vperm.xlu1 %892, %v480_v17  }
 0x186   : > { %v479_v20 = vpop.xlane.xlu0 %478 }
 0x187   : > { %v481_v21 = vmax.f32 %v472_v18, %v479_v20  ;;  %v484_v36 = vmul.f32 1.442695, %v482_v19 }
 0x189   : > { %v483_v22 = vsub.f32 %v472_v18, %v481_v21  ;;  %591 = vst.msk [vmem:[#allocation2 + $0x8] sm:$0xff] %vm394_vm2, %v481_v21  ;;  %495 = vperm.xlu1 %892, %v481_v21  }
 0x18b   : > { %v486_v35 = vmul.f32 1.442695, %v483_v22 }
 0x204   : > { %v491_v24 = vpop.permute.xlu1 %490 }
 0x205   : > { %v498_v25 = vsub.f32 %v465_v7, %v491_v24 }
 0x207   : > { %v500_v26 = vmul.f32 1.442695, %v498_v25 }
 0x208   : > { %v496_v27 = vpop.permute.xlu1 %495 }
 0x209   : > { %897 = vpow2.f32 %v500_v26  ;;  %v499_v28 = vsub.f32 %v468_v10, %v496_v27 }
 0x20b   : > { %v502_v29 = vmul.f32 1.442695, %v499_v28 }
 0x20d   : > { %899 = vpow2.f32 %v502_v29 }
 0x20e   : > { %901 = vpow2.f32 %v486_v35 }
 0x20f   : > { %903 = vpow2.f32 %v484_v36 }
 0x213   : > { %v898_v30 = vpop.eup %897 }
 0x214   : > { %v508_v31 = vsel %vm473_vm3, %v898_v30, 0.0 }
 0x215   : > { %509 = vadd.xlane.f32.xlu0 %v508_v31 }
 0x217   : > { %v900_v32 = vpop.eup %899 }
 0x218   : > { %v511_v33 = vsel %vm473_vm3, %v900_v32, 0.0  ;;  %v533_v34 = vpack.c.bf16 %v900_v32, %v898_v30  ;;  %v902_v37 = vpop.eup %901 }
 0x219   : > { %512 = vadd.xlane.f32.xlu1 %v511_v33  ;;  %v904_v38 = vpop.eup %903  ;;  %v507_v44 = vmul.f32 %v902_v37, %v505_v42 }
 0x21a   : > { %845 = vmatmul.mubr.msk.bf16.vlgmr.msra.gmra.mrb[0].mxu1 %vm473_vm3, %v533_v34  ;;  %v506_v40 = vmul.f32 %v904_v38, %v504_v39 }
 0x22a   : > { %528 = vperm.xlu1 %892, %v902_v37  }
 0x22b   : > { %523 = vperm.xlu0 %893, %v904_v38  }
 0x2a2   : > { %v510_v41 = vpop.xlane.xlu0 %509 }
 0x2a3   : > { %v514_v43 = vadd.f32 %v510_v41, %v506_v40 }
 0x2a5   : > { %517 = vst.msk [vmem:[#allocation3] sm:$0xff] %vm394_vm2, %v514_v43 }
 0x2a6   : > { %v513_v45 = vpop.xlane.xlu1 %512 }
 0x2a7   : > { %v515_v46 = vadd.f32 %v513_v45, %v507_v44 }
 0x2a9   : > { %518 = vst.msk [vmem:[#allocation3 + $0x8] sm:$0xff] %vm394_vm2, %v515_v46 }
 0x2aa   : > { %v524_v50 = vpop.permute.xlu0 %523  ;;  %v529_v52 = vpop.permute.xlu1 %528 }
 0x2ab   : > { %v531_v53 = vmul.f32 %v524_v50, %v519_v49  ;;  %v532_v55 = vmul.f32 %v529_v52, %v520_v51 }
 0x2ac   : > { %v597_v47 = vld [vmem:[#allocation3] sm:$0xff] }
 0x2ad   : > { %601 = vperm.xlu0 %893, %v597_v47  }
 0x2b0   : > { %v598_v48 = vld [vmem:[#allocation3 + $0x8] sm:$0xff] }
 0x2b1   : > { %606 = vperm.xlu0 %893, %v598_v48  }
 0x2ed   : > { %v579_v54 = vpop.f32.mrb[0].mxu1 }
 0x2ee   : > { %v586_v56 = vadd.f32 %v579_v54, %v531_v53  ;;  %v846_v57 = vpop.f32.mrb[1].mxu1 }
 0x2ef   : > { %v582_v58 = vpop.f32.mrb[2].mxu1 }
 0x2f0   : > { %588 = vst.msk [vmem:[#allocation4] sm:$0xff] %vm399_vm0, %v586_v56  ;;  %v587_v59 = vadd.f32 %v582_v58, %v532_v55  ;;  %v847_v60 = vpop.f32.mrb[3].mxu1 }
 0x2f2   : > { %589 = vst.msk [vmem:[#allocation4 + $0x8] sm:$0xff] %vm399_vm0, %v587_v59 }
 0x2f7   : > { %v595_v0 = vld [vmem:[#allocation4] sm:$0xff] }
 0x2f9   : > { %v596_v4 = vld [vmem:[#allocation4 + $0x8] sm:$0xff] }
 0x32c   : > { %v602_v61 = vpop.permute.xlu0 %601 }
 0x32d   : > { %905 = vrcp.f32 %v602_v61 }
 0x330   : > { %v607_v62 = vpop.permute.xlu0 %606 }
 0x331   : > { %907 = vrcp.f32 %v607_v62 }
 0x337   : > { %v906_v63 = vpop.eup %905 }
 0x338   : > { %v610_v1 = vmul.f32 %v906_v63, %v595_v0 }
 0x33a   : > { %v830_v2 = vpack.c.bf16 %v610_v1, %v610_v1 }
 0x33b   : > { %v908_v3 = vpop.eup %907 }
 0x33c   : > { %622 = vst.msk [vmem:[%s387_s13] sm:$0xf] %vm621_vm4, %v830_v2  ;;  %v612_v5 = vmul.f32 %v908_v3, %v596_v4 }
 0x33e   : > { %v831_v6 = vpack.c.bf16 %v612_v5, %v612_v5 }
 0x340   : > { %623 = vst.msk [vmem:[%s387_s13 + $0x4] sm:$0xf] %vm621_vm4, %v831_v6 }
 0x341 PF: > { %s14_s19 = sadd.s32 1, %s947_s19   ;;  %s1068_s15 = smov %s939_s17 }
 0x342   : > { %p11_p7 = scmp.ge.s32.totalorder %s14_s19, 10   ;;  %s1069_s16 = smov %s943_s18 }
 0x343   : > { %s1070_s17 = smov %s1073_s20  ;;  %s1071_s18 = smov %s1077_s21 }
 0x344   :  { %13 = sbr.rel (!%p11_p7) target bundleno = 3 (0x3), region = 83 }

</bundles_post_ra>
